<compile_context>
chip_gen: v7x
topology: tpu7x:2x2x1
jax: 0.10.0
libtpu: 0.0.40
codegen_flags: <defaults>
</compile_context>

<pallas_src>
import functools

import jax
import jax.numpy as jnp
from jax.experimental import pallas as pl
from jax.experimental.pallas import tpu as pltpu


def _round_up(x, m):
    return ((x + m - 1) // m) * m


@functools.lru_cache(maxsize=1)
def _vmem_budget_bytes():
    """Generation-aware VMEM budget (~80% of physical, conservative fallback)."""
    try:
        phys = int(pltpu.get_tpu_info().vmem_capacity_bytes)
    except Exception:
        phys = 64 << 20  # conservative: v7x per-TC size
    return max(24 << 20, int(phys * 0.80))


def prepare_t5_ffn_weights(wi, wo, compute_dtype=None, ff_multiple=None):
    """One-time weight prep OUTSIDE the jit'd call path.

    wi: (d_ff, d_model)  nn.Linear(d_model, d_ff).weight
    wo: (d_model, d_ff)  nn.Linear(d_ff, d_model).weight
    Returns wi_t = Wi^T (d_model, d_ff[, padded]), wo_t = Wo^T (d_ff[, padded], d_model).
    """
    wi_t = jnp.asarray(wi).T
    wo_t = jnp.asarray(wo).T
    if compute_dtype is not None:
        wi_t = wi_t.astype(compute_dtype)
        wo_t = wo_t.astype(compute_dtype)
    if ff_multiple is not None:
        d_ff = wi_t.shape[1]
        d_ff_pad = _round_up(d_ff, ff_multiple)
        if d_ff_pad != d_ff:
            wi_t = jnp.pad(wi_t, ((0, 0), (0, d_ff_pad - d_ff)))
            wo_t = jnp.pad(wo_t, ((0, d_ff_pad - d_ff), (0, 0)))
    return jnp.asarray(wi_t), jnp.asarray(wo_t)


def _ffn_kernel_resident(x_ref, wi_ref, wo_ref, o_ref):
    # x_ref:  (tm, d_model); wi_ref: (d_model, d_ff); wo_ref: (d_ff, d_model)
    x = x_ref[...]
    h = jnp.dot(x.astype(wi_ref.dtype), wi_ref[...],
                preferred_element_type=jnp.float32)
    h = jnp.maximum(h, 0.0)
    # Dropout: identity at inference time (eval mode).
    y = jnp.dot(h.astype(wo_ref.dtype), wo_ref[...],
                preferred_element_type=jnp.float32)
    o_ref[...] = y.astype(o_ref.dtype)


def _ffn_kernel_streamed(x_ref, wi_ref, wo_ref, o_ref, acc_ref):
    # x_ref:  (tm, d_model); wi_ref: (d_model, tf); wo_ref: (tf, d_model)
    # acc_ref: (tm, d_model) f32 accumulator across the d_ff (k) grid axis.
    k = pl.program_id(1)

    @pl.when(k == 0)
    def _():
        acc_ref[...] = jnp.zeros_like(acc_ref)

    x = x_ref[...]
    h = jnp.dot(x.astype(wi_ref.dtype), wi_ref[...],
                preferred_element_type=jnp.float32)
    h = jnp.maximum(h, 0.0)
    # Dropout: identity at inference time (eval mode).
    acc_ref[...] += jnp.dot(h.astype(wo_ref.dtype), wo_ref[...],
                            preferred_element_type=jnp.float32)

    @pl.when(k == pl.num_programs(1) - 1)
    def _():
        o_ref[...] = acc_ref[...].astype(o_ref.dtype)


@functools.partial(jax.jit, static_argnames=("tm", "tf", "weights_resident"))
def t5_dense_relu_dense(hidden_states, wi_t, wo_t, *, tm=None, tf=None,
                        weights_resident=None):
    """Fused T5 FFN: relu(x @ Wi^T) @ Wo^T  (dropout = identity, eval mode).

    hidden_states: (..., d_model)
    wi_t: (d_model, d_ff)  == Wi^T   (prepared once via prepare_t5_ffn_weights)
    wo_t: (d_ff, d_model)  == Wo^T
    """
    orig_shape = hidden_states.shape
    d_model = orig_shape[-1]
    dm_w, d_ff = wi_t.shape
    assert dm_w == d_model and wo_t.shape == (d_ff, d_model)

    M = 1
    for s in orig_shape[:-1]:
        M *= s
    x2d = hidden_states.reshape(M, d_model)

    in_dt = hidden_states.dtype
    x_item = jnp.dtype(in_dt).itemsize
    w_item = jnp.dtype(wi_t.dtype).itemsize

    budget = _vmem_budget_bytes()
    big_vmem = budget >= (80 << 20)

    # Both weights, conservatively counted double-buffered.
    w_bytes_2buf = 2 * 2 * d_model * d_ff * w_item
    if weights_resident is None:
        weights_resident = w_bytes_2buf <= int(0.40 * budget)

    # --- M (token) tiling ----------------------------------------------------
    if tm is None:
        tm = 512 if weights_resident else (1024 if big_vmem else 512)
    tm_eff = min(tm, _round_up(M, 16))
    tm_eff = max(16, (tm_eff // 16) * 16)

    def vmem_need_resident(tm_):
        return (2 * tm_ * d_model * x_item      # x tiles (2 bufs)
                + w_bytes_2buf                  # resident weights
                + 2 * tm_ * d_model * x_item    # out tiles (2 bufs)
                + tm_ * d_ff * 4)               # f32 intermediate h

    def vmem_need_streamed(tm_, tf_):
        return (2 * tm_ * d_model * x_item
                + 2 * d_model * tf_ * w_item    # Wi^T tile (2 bufs)
                + 2 * tf_ * d_model * w_item    # Wo^T tile (2 bufs)
                + 2 * tm_ * d_model * x_item
                + tm_ * d_model * 4             # acc scratch
                + tm_ * tf_ * 4)                # f32 intermediate h

    if weights_resident:
        while vmem_need_resident(tm_eff) > budget and tm_eff > 128:
            tm_eff = max(128, tm_eff // 2)
        if vmem_need_resident(tm_eff) > budget:
            weights_resident = False  # weights too big to hold; stream instead

    d_ff_eff, tf_eff = d_ff, d_ff
    if not weights_resident:
        if tf is None:
            tf = 1024
        tf_eff = min(tf, d_ff)
        tf_eff = max(128, (tf_eff // 128) * 128)
        while vmem_need_streamed(tm_eff, tf_eff) > budget and tf_eff > 128:
            tf_eff = max(128, tf_eff // 2)
        while vmem_need_streamed(tm_eff, tf_eff) > budget and tm_eff > 128:
            tm_eff = max(128, tm_eff // 2)
        d_ff_eff = _round_up(d_ff, tf_eff)
        if d_ff_eff != d_ff:
            # Zero columns of Wi^T / zero rows of Wo^T are inert through
            # relu + matmul.  (Production callers: pre-pad in
            # prepare_t5_ffn_weights(ff_multiple=...) to avoid per-call pads.)
            wi_t = jnp.pad(wi_t, ((0, 0), (0, d_ff_eff - d_ff)))
            wo_t = jnp.pad(wo_t, ((0, d_ff_eff - d_ff), (0, 0)))

    m_pad = _round_up(M, tm_eff)
    if m_pad != M:
        x2d = jnp.pad(x2d, ((0, m_pad - M), (0, 0)))
    m_tiles = m_pad // tm_eff

    vmem_limit = int(budget)

    # --- cost estimate (accounts for weight re-streaming when not resident) --
    w_bytes_total = 2 * d_model * d_ff * w_item
    w_stream_bytes = w_bytes_total if weights_resident else w_bytes_total * m_tiles
    cost = pl.CostEstimate(
        flops=4 * M * d_model * d_ff,
        transcendentals=0,
        bytes_accessed=2 * M * d_model * x_item + w_stream_bytes)

    if weights_resident:
        out2d = pl.pallas_call(
            _ffn_kernel_resident,
            out_shape=jax.ShapeDtypeStruct((m_pad, d_model), in_dt),
            grid_spec=pltpu.PrefetchScalarGridSpec(
                num_scalar_prefetch=0,
                grid=(m_tiles,),
                in_specs=[
                    pl.BlockSpec((tm_eff, d_model), lambda i: (i, 0)),   # x
                    pl.BlockSpec((d_model, d_ff), lambda i: (0, 0)),     # Wi^T (DMA once)
                    pl.BlockSpec((d_ff, d_model), lambda i: (0, 0)),     # Wo^T (DMA once)
                ],
                out_specs=pl.BlockSpec((tm_eff, d_model), lambda i: (i, 0)),
            ),
            compiler_params=pltpu.CompilerParams(
                dimension_semantics=("parallel",),
                vmem_limit_bytes=vmem_limit),
            cost_estimate=cost,
        )(x2d, wi_t, wo_t)
    else:
        out2d = pl.pallas_call(
            _ffn_kernel_streamed,
            out_shape=jax.ShapeDtypeStruct((m_pad, d_model), in_dt),
            grid_spec=pltpu.PrefetchScalarGridSpec(
                num_scalar_prefetch=0,
                grid=(m_tiles, d_ff_eff // tf_eff),
                in_specs=[
                    pl.BlockSpec((tm_eff, d_model), lambda i, k: (i, 0)),   # x
                    pl.BlockSpec((d_model, tf_eff), lambda i, k: (0, k)),   # Wi^T slice
                    pl.BlockSpec((tf_eff, d_model), lambda i, k: (k, 0)),   # Wo^T slice
                ],
                out_specs=pl.BlockSpec((tm_eff, d_model), lambda i, k: (i, 0)),
                scratch_shapes=[pltpu.VMEM((tm_eff, d_model), jnp.float32)],
            ),
            compiler_params=pltpu.CompilerParams(
                dimension_semantics=("parallel", "arbitrary"),
                vmem_limit_bytes=vmem_limit),
            cost_estimate=cost,
        )(x2d, wi_t, wo_t)

    return out2d[:M].reshape(orig_shape)


if __name__ == "__main__":
    # Small T5-style config: d_model=32, d_ff=64, batch=2, seq=8.
    B, S, d_model, d_ff = 2, 8, 32, 64

    key = jax.random.PRNGKey(0)
    k_x, k_wi, k_wo = jax.random.split(key, 3)

    x = jax.random.normal(k_x, (B, S, d_model), dtype=jnp.float32)
    # nn.Linear weight shapes: wi -> (d_ff, d_model), wo -> (d_model, d_ff).
    wi = jax.random.normal(k_wi, (d_ff, d_model), dtype=jnp.float32) * 0.05
    wo = jax.random.normal(k_wo, (d_model, d_ff), dtype=jnp.float32) * 0.05

    # Reference in plain JAX (eval-mode dropout = identity).
    ref = jnp.maximum(x @ wi.T, 0.0) @ wo.T

    # 1) f32 path, weights-resident (auto) — exact match expected.
    wi_t, wo_t = prepare_t5_ffn_weights(wi, wo)
    out = jax.block_until_ready(t5_dense_relu_dense(x, wi_t, wo_t))
    assert out.shape == (B, S, d_model)
    assert jnp.allclose(out, ref, atol=1e-5, rtol=1e-5), "resident f32 mismatch"

    # 2) f32 path, forced weight-streaming with d_ff padding — exercises the
    #    reduction-axis kernel; still exact.
    out_s = jax.block_until_ready(
        t5_dense_relu_dense(x, wi_t, wo_t, weights_resident=False, tf=128))
    assert jnp.allclose(out_s, ref, atol=1e-5, rtol=1e-5), "streamed f32 mismatch"

    # 3) bf16 compute path (recommended for production: 2-4x MXU rate, half the
    #    weight HBM bytes) — f32 accumulation, loose tolerance vs f32 reference.
    wi_bt, wo_bt = prepare_t5_ffn_weights(wi, wo, compute_dtype=jnp.bfloat16)
    out_b = jax.block_until_ready(t5_dense_relu_dense(x, wi_bt, wo_bt))
    assert out_b.shape == (B, S, d_model)
    assert jnp.allclose(out_b, ref, atol=2e-2, rtol=5e-2), "bf16 mismatch"

    print("KERNEL_OK")
</pallas_src>

<mosaic_0001>
module attributes {stable_mosaic.version = 11 : i64} {
  func.func @_ffn_kernel_resident(%arg0: i32, %arg1: memref<16x32xf32, #tpu.memory_space<vmem>>, %arg2: memref<32x64xf32, #tpu.memory_space<vmem>>, %arg3: memref<64x32xf32, #tpu.memory_space<vmem>>, %arg4: memref<16x32xf32, #tpu.memory_space<vmem>>) attributes {dimension_semantics = [#tpu.dimension_semantics<parallel>], iteration_bounds = array<i64: 1>, scalar_prefetch = 0 : i64, scratch_operands = 0 : i64, tpu.core_type = #tpu.core_type<tc>, window_params = [{transform_indices = @transform_0, window_bounds = array<i64: 16, 32>}, {pipeline_mode = #tpu.pipeline_mode<synchronous>, transform_indices = @transform_1, window_bounds = array<i64: 32, 64>}, {pipeline_mode = #tpu.pipeline_mode<synchronous>, transform_indices = @transform_2, window_bounds = array<i64: 64, 32>}, {transform_indices = @transform_3, window_bounds = array<i64: 16, 32>}]} {
    %c0 = arith.constant 0 : index
    %c0_0 = arith.constant 0 : index
    %0 = vector.load %arg1[%c0, %c0_0] : memref<16x32xf32, #tpu.memory_space<vmem>>, vector<16x32xf32>
    %c0_1 = arith.constant 0 : index
    %c0_2 = arith.constant 0 : index
    %1 = vector.load %arg2[%c0_1, %c0_2] : memref<32x64xf32, #tpu.memory_space<vmem>>, vector<32x64xf32>
    %cst = arith.constant dense<0.000000e+00> : vector<16x64xf32>
    %2 = tpu.matmul %0, %1, %cst {dimension_numbers = #tpu.dot_dimension_numbers<[1], [0], [0], [1], [0, 0, 1, 1], [], []>} : vector<16x32xf32>, vector<32x64xf32>, vector<16x64xf32> -> vector<16x64xf32>
    %cst_3 = arith.constant 0.000000e+00 : f32
    %3 = vector.broadcast %cst_3 : f32 to vector<16x64xf32>
    %4 = arith.maximumf %2, %3 : vector<16x64xf32>
    %c0_4 = arith.constant 0 : index
    %c0_5 = arith.constant 0 : index
    %5 = vector.load %arg3[%c0_4, %c0_5] : memref<64x32xf32, #tpu.memory_space<vmem>>, vector<64x32xf32>
    %cst_6 = arith.constant dense<0.000000e+00> : vector<16x32xf32>
    %6 = tpu.matmul %4, %5, %cst_6 {dimension_numbers = #tpu.dot_dimension_numbers<[1], [0], [0], [1], [0, 0, 1, 1], [], []>} : vector<16x64xf32>, vector<64x32xf32>, vector<16x32xf32> -> vector<16x32xf32>
    %c0_7 = arith.constant 0 : index
    %c0_8 = arith.constant 0 : index
    %7 = vector.load %arg4[%c0_7, %c0_8] : memref<16x32xf32, #tpu.memory_space<vmem>>, vector<16x32xf32>
    tpu.vector_store %arg4[%c0_7, %c0_8], %6 {strides = array<i32>} : memref<16x32xf32, #tpu.memory_space<vmem>>, vector<16x32xf32>,
    return
  }
  func.func @transform_0(%arg0: i32) -> (i32, i32) {
    %c0_i32 = arith.constant 0 : i32
    %c0_i32_0 = arith.constant 0 : i32
    return %arg0, %c0_i32 : i32, i32
  }
  func.func @transform_1(%arg0: i32) -> (i32, i32) {
    %c0_i32 = arith.constant 0 : i32
    %c0_i32_0 = arith.constant 0 : i32
    %c0_i32_1 = arith.constant 0 : i32
    return %c0_i32, %c0_i32_0 : i32, i32
  }
  func.func @transform_2(%arg0: i32) -> (i32, i32) {
    %c0_i32 = arith.constant 0 : i32
    %c0_i32_0 = arith.constant 0 : i32
    %c0_i32_1 = arith.constant 0 : i32
    return %c0_i32, %c0_i32_0 : i32, i32
  }
  func.func @transform_3(%arg0: i32) -> (i32, i32) {
    %c0_i32 = arith.constant 0 : i32
    %c0_i32_0 = arith.constant 0 : i32
    return %arg0, %c0_i32 : i32, i32
  }
}

</mosaic_0001>

<bundles_post_ra>
// kernel: t5_dense_relu_dense.1
= control target key start
LH: loop header
LB: loop body
LE: loop exit
PB: predicated region body
PF: predicated region fallthrough
CT: control target
= control target key end

     0   :  { %vm21_vm0 = vcmask 261120   ;;  %s395_s0 = inlined_call_operand.vmem [shape: f32[16,32], index: 0, kind: input, shape index: {}]   ;;  %s396_s1 = inlined_call_operand.vmem [shape: f32[32,64], index: 1, kind: input, shape index: {}]   ;;  %s397_s2 = inlined_call_operand.vmem [shape: f32[64,32], index: 2, kind: input, shape index: {}]   ;;  %s398_s3 = inlined_call_operand.hbm [shape: f32[16,32], index: 3, kind: output, shape index: {}]  }
   0x1   :  { %v17_v0 = vld [vmem:[%s396_s1] sm:$0xff]  ;;  %v18_v1 = vld [vmem:[%s396_s1 + $0x8] sm:$0xff]  ;;  %v19_v2 = vld [vmem:[%s396_s1 + $0x10] sm:$0xff] }
   0x2   :  { %v263_v3 = vpack.c.bf16 %v18_v1, %v17_v0  ;;  %v20_v4 = vld [vmem:[%s396_s1 + $0x18] sm:$0xff]  ;;  %v15_v5 = vld [vmem:[%s395_s0] sm:$0xff]  ;;  %v106_v8 = vld [vmem:[%s397_s2 + $0x8] sm:$0xff] }
   0x3   :  { %v267_v6 = vpack.c.bf16 %v20_v4, %v19_v2  ;;  %241 = vmatprep.mubr.msk.f32.mxu0 %vm21_vm0, %v15_v5  ;;  %v105_v7 = vld [vmem:[%s397_s2] sm:$0xff]  ;;  %v107_v9 = vld [vmem:[%s397_s2 + $0x10] sm:$0xff]  ;;  %v108_v11 = vld [vmem:[%s397_s2 + $0x18] sm:$0xff] }
   0x4   :  { %264 = vmatprep.subr.bf16.mxu0 %v263_v3  ;;  %v271_v10 = vpack.c.bf16 %v106_v8, %v105_v7  ;;  %v275_v12 = vpack.c.bf16 %v108_v11, %v107_v9  ;;  %v109_v13 = vld [vmem:[%s397_s2 + $0x20] sm:$0xff]  ;;  %v110_v14 = vld [vmem:[%s397_s2 + $0x28] sm:$0xff] }
   0x5   :  { %266 = vmatpush3.bf16.msra.mxu0 %v263_v3 }
   0x6   :  { %8 = vsyncpa [#allocation3], 0  ;;  %268 = vmatprep.subr.bf16.mxu0 %v267_v6  ;;  %272 = vmatprep.subr.bf16.mxu1 %v271_v10  ;;  %v279_v15 = vpack.c.bf16 %v110_v14, %v109_v13  ;;  %v16_v16 = vld [vmem:[%s395_s0 + $0x8] sm:$0xff]  ;;  %v111_v17 = vld [vmem:[%s397_s2 + $0x30] sm:$0xff]  ;;  %vm113_vm1 = vcmask 523264   ;;  %s314_s0 = smov [#allocation2]  }
   0x7   :  { %274 = vmatpush3.bf16.msra.mxu1 %v271_v10  ;;  %v112_v18 = vld [vmem:[%s397_s2 + $0x38] sm:$0xff]  ;;  %s202_s12 = sshll.u32 %s314_s0, 4  ;;  %s203_s12 = int_to_ptr.vmem [resolvable:$true] %s202_s12 }
   0x8   :  { %276 = vmatprep.subr.bf16.mxu1 %v275_v12  ;;  %v283_v19 = vpack.c.bf16 %v112_v18, %v111_v17  ;;  %s290_s2 = scalar_lea.vmem %s203_s12, 256  ;;  %p295_p1 = scmp.lt.s32.totalorder %s203_s12, %s203_s12 }
   0x9   :  { %270 = vmatpush3.bf16.msra.mxu0 %v267_v6  ;;  %p291_p0 = scmp.ne.s32.totalorder %s203_s12, %s290_s2  ;;  %p296_p2 = scmp.lt.s32.totalorder %s290_s2, %s290_s2 }
   0xb   :  { %278 = vmatpush3.bf16.msra.mxu1 %v275_v12  ;;  %p297_p3 = por %p296_p2, %p295_p1 }
   0xc   :  { %242 = vmatmul.mubr.msk.f32.vlgmr.msra.gmra.mrb[0].mxu0 %vm21_vm0, %v16_v16  ;;  %280 = vmatprep.subr.bf16.mxu1 %v279_v15 }
   0xd   :  { %p298_p4 = pnand %p297_p3, %p291_p0 }
   0xf   :  { %282 = vmatpush3.bf16.msra.mxu1 %v279_v15 }
  0x10   :  { %284 = vmatprep.subr.bf16.mxu1 %v283_v19 }
  0x13   :  { %286 = vmatpush3.bf16.msra.mxu1 %v283_v19 }
  0xdf   :  { %v243_v20 = vpop.f32.mrb[0].mxu0 }
  0xe0   :  { %v94_v21 = vpop.f32.mrb[1].mxu0  ;;  %v104_v23 = vmax.f32 %v243_v20, 0.0 }
  0xe1   :  { %v103_v22 = vmax.f32 %v94_v21, 0.0 }
  0xe3   :  { %260 = vmatprep.mubr.msk.f32.mxu1 %vm113_vm1, %v103_v22 }
  0xe4   :  { %261 = vmatmul.mubr.msk.f32.vlgmr.msra.gmra.mrb[0].mxu1 %vm113_vm1, %v104_v23 }
 0x1b7   :  { %v262_v24 = vpop.f32.mrb[0].mxu1 }
 0x1b8   :  { %196 = vst.msk [vmem:[#allocation2 + $0x8] sm:$0xff] %vm21_vm0, %v262_v24  ;;  %v186_v25 = vpop.f32.mrb[1].mxu1 }
 0x1b9   :  { %195 = vst.msk [vmem:[#allocation2] sm:$0xff] %vm21_vm0, %v186_v25 }
 0x1ba   :  { %301 = shalt.err (!%p298_p4)
}
 0x1bb   :  { %s302_s15 = scalar_lea.hbm %s398_s3, 256 }
 0x1bc   :  { %p303_p5 = scmp.ne.s32.totalorder %s398_s3, %s302_s15  ;;  %p306_p6 = scmp.lt.u32.totalorder %s302_s15, %s398_s3 }
 0x1be   :  { %p308_p7 = pnand %p306_p6, %p303_p5 }
 0x1c0   :  { %311 = shalt.err (!%p308_p7)
}
 0x1c1   :  { %s315_s20 = smov 128   ;;  %s316_s21 = smov 8  }
 0x1c2   :  { %208 = dma.vmem_to_hbm [thread:$0]  %s203_s12, 256, %s398_s3, [#allocation3], %s315_s20, %s315_s20, %s316_s21  }
 0x1c3   :  { %312 = dma.done.wait [#allocation3], 256  }
 0x1c4   :  { %313 = vsyncadd [#allocation3], 4294967040 }
 0x1c5   :  { %212 = vsyncpa [#allocation3], 1 }

</bundles_post_ra>
